<compile_context>
chip_gen: v7x
topology: tpu7x:2x2x1
jax: 0.10.0
libtpu: 0.0.40
codegen_flags: <defaults>
</compile_context>

<pallas_src>
import math

import jax
import jax.numpy as jnp
from jax import lax
from jax.experimental import pallas as pl
from jax.experimental.pallas import tpu as pltpu

INPUT_DIM = 7          # module default input_dim
HIDDEN = 128           # module default hidden_dim (lane-dense on TPU)
POOL_RATIO = 0.5
BN_EPS = 1e-5
_VMEM_LIMIT = 32 * 1024 * 1024   # safe on v5e/v6e (128 MiB) and v7x (64 MiB)


# --------------------------------------------------------------------------
# Pallas kernels
# --------------------------------------------------------------------------
def _normalize_block(a_ref, drow_ref, dcol_ref):
    """On-the-fly D^-1/2 (A + I) D^-1/2 for one (tm, N) row block (VPU work)."""
    tm, n = a_ref.shape
    row0 = pl.program_id(0) * tm
    rows = row0 + lax.broadcasted_iota(jnp.int32, (tm, n), 0)
    cols = lax.broadcasted_iota(jnp.int32, (tm, n), 1)
    a_hat = a_ref[...].astype(jnp.float32) + (rows == cols).astype(jnp.float32)
    return (a_hat * drow_ref[...]) * dcol_ref[...]


def gcn_block_kernel(a_ref, drow_ref, dcol_ref, x_ref, wcf_ref, b_ref,
                     scale_ref, shift_ref, ws_ref, h_ref, z_ref):
    # Row block of the normalized adjacency (never materialized in HBM).
    a_norm = _normalize_block(a_ref, drow_ref, dcol_ref)
    # Fused GCNConv + Linear:  A_norm @ (X @ (Wc@Wf)) + (bc@Wf + bf)
    xw = jnp.dot(x_ref[...], wcf_ref[...], preferred_element_type=jnp.float32)
    u = jnp.dot(a_norm.astype(jnp.bfloat16), xw.astype(jnp.bfloat16),
                preferred_element_type=jnp.float32) + b_ref[...]
    # ReLU + BatchNorm1d (inference; running stats folded into scale/shift).
    h = jnp.maximum(u, 0.0) * scale_ref[...] + shift_ref[...]
    h_ref[...] = h                                   # lane-dense (tm, 128) store
    # SAGPooling score projection h @ Ws as a VPU/XLU reduction
    # (avoids a 1-output-column MXU matmul competing with the big matmul).
    z_ref[...] = jnp.sum(h * ws_ref[...], axis=-1, keepdims=True)


def score_prop_kernel(a_ref, drow_ref, dcol_ref, z_ref, bs_ref, s_ref):
    # Second pass: s = A_norm @ z + bs  (needs z from ALL rows, so it cannot be
    # produced in the same row-streaming pass as h).
    a_norm = _normalize_block(a_ref, drow_ref, dcol_ref)
    s_ref[...] = jnp.dot(a_norm, z_ref[...],
                         preferred_element_type=jnp.float32) + bs_ref[...]


# --------------------------------------------------------------------------
# pallas_call wrappers
# --------------------------------------------------------------------------
def _row_tile(n):
    """Row tile for streaming the (n, n) bf16 adjacency: multiple of 8 that
    divides n, sized so a double-buffered block stays well under ~24 MiB
    (fits v7x's 64 MiB physical / 32 MiB scoped VMEM; fine on v5e/v6e too)."""
    if n <= 256:
        return n
    budget = 12 * 1024 * 1024                     # per buffer (x2 double-buffer)
    cap = max(8, min(512, budget // (2 * n)))     # 2 bytes/elem (bf16)
    tm = (cap // 8) * 8
    while tm > 8 and n % tm:
        tm -= 8
    return tm if n % tm == 0 else n


def gcn_layer(a_raw, d_inv_sqrt, x, p):
    """One fused layer: conv+fc -> ReLU -> BN -> SAG score GNN."""
    n, c_in = x.shape
    h_dim = p["wcf"].shape[1]
    tm = _row_tile(n)
    grid = (n // tm,)
    drow = d_inv_sqrt.reshape(n, 1)
    dcol = d_inv_sqrt.reshape(1, n)

    def row_spec(last):
        return pl.BlockSpec((tm, last), lambda i: (i, 0))

    def const2(shape):
        return pl.BlockSpec(shape, lambda i: (0, 0))

    cparams = pltpu.CompilerParams(
        dimension_semantics=("parallel",),        # megacore / 2 TCs on v7x
        vmem_limit_bytes=_VMEM_LIMIT)

    nb = grid[0]
    cost1 = pl.CostEstimate(
        flops=2 * n * n * h_dim + 2 * n * c_in * h_dim * nb,
        transcendentals=0,
        bytes_accessed=n * n * 2 + n * c_in * 4 + n * h_dim * 4 + 12 * n)

    h, z = pl.pallas_call(
        gcn_block_kernel,
        grid=grid,
        out_shape=(jax.ShapeDtypeStruct((n, h_dim), jnp.float32),
                   jax.ShapeDtypeStruct((n, 1), jnp.float32)),
        in_specs=[row_spec(n),                    # raw 0/1 adjacency (bf16), streamed
                  row_spec(1),                    # d^-1/2 for this row block
                  const2((1, n)),                 # d^-1/2 for all columns (resident)
                  const2((n, c_in)),              # X (resident)
                  const2((c_in, h_dim)),          # Wc @ Wf
                  const2((1, h_dim)),             # bc @ Wf + bf
                  const2((1, h_dim)),             # BN scale
                  const2((1, h_dim)),             # BN shift
                  const2((1, h_dim))],            # Ws (row vector)
        out_specs=(pl.BlockSpec((tm, h_dim), lambda i: (i, 0)),
                   pl.BlockSpec((tm, 1), lambda i: (i, 0))),
        compiler_params=cparams,
        cost_estimate=cost1,
    )(a_raw, drow, dcol, x, p["wcf"], p["b"], p["scale"], p["shift"], p["ws"])

    cost2 = pl.CostEstimate(flops=2 * n * n, transcendentals=0,
                            bytes_accessed=n * n * 2 + 12 * n)
    s = pl.pallas_call(
        score_prop_kernel,
        grid=grid,
        out_shape=jax.ShapeDtypeStruct((n, 1), jnp.float32),
        in_specs=[row_spec(n),
                  row_spec(1),
                  const2((1, n)),
                  const2((n, 1)),                 # z (resident)
                  const2((1, 1))],                # bs
        out_specs=pl.BlockSpec((tm, 1), lambda i: (i, 0)),
        compiler_params=cparams,
        cost_estimate=cost2,
    )(a_raw, drow, dcol, z, p["bs"])
    return h, s


# --------------------------------------------------------------------------
# Plain-JAX glue (dynamic-shape graph ops, static equal-size graphs)
# --------------------------------------------------------------------------
def sag_pool(h, score, a, nodes_per_graph, ratio):
    """SAGPooling: per-graph top-k by score, gate by tanh(score), induced A."""
    num_graphs = h.shape[0] // nodes_per_graph
    k = int(math.ceil(ratio * nodes_per_graph))
    s = score.reshape(num_graphs, nodes_per_graph)
    top_v, top_i = jax.lax.top_k(s, k)
    perm = (top_i + (jnp.arange(num_graphs) * nodes_per_graph)[:, None]).reshape(-1)
    gate = jnp.tanh(top_v).reshape(-1, 1)
    h_new = jnp.take(h, perm, axis=0) * gate
    a_new = jnp.take(jnp.take(a, perm, axis=0), perm, axis=1)
    return h_new, a_new, k


def gcn_forward(x, a_raw01, nodes_per_graph, params_list, ratio=POOL_RATIO):
    h = x
    a = a_raw01.astype(jnp.bfloat16)   # 0/1 exact in bf16; halves adjacency HBM bytes
    n = nodes_per_graph
    for p in params_list:
        deg = jnp.sum(a, axis=1, dtype=jnp.float32) + 1.0   # + self loop
        d_inv_sqrt = jax.lax.rsqrt(deg)
        h, s = gcn_layer(a, d_inv_sqrt, h, p)               # conv+fc+relu+bn | score
        h, a, n = sag_pool(h, s, a, n, ratio)
        # Dropout: identity in inference mode.
    num_graphs = h.shape[0] // n
    # global_mean_pool
    return h.reshape(num_graphs, n, -1).mean(axis=1)


# --------------------------------------------------------------------------
# Parameters (raw module params -> folded kernel params)
# --------------------------------------------------------------------------
def fold_layer_params(raw):
    wcf = raw["wc"] @ raw["wf"]                       # conv+fc fusion
    b = raw["bc"] @ raw["wf"] + raw["bf"]
    inv_std = jax.lax.rsqrt(raw["running_var"] + BN_EPS)
    scale = raw["gamma"] * inv_std                    # BN fold (inference)
    shift = raw["beta"] - raw["running_mean"] * scale
    return dict(wcf=wcf.astype(jnp.float32), b=b.astype(jnp.float32),
                scale=scale.astype(jnp.float32), shift=shift.astype(jnp.float32),
                ws=raw["ws"].reshape(1, -1).astype(jnp.float32),
                bs=raw["bs"].reshape(1, 1).astype(jnp.float32))


def init_layer_params(key, c_in, h_dim):
    ks = jax.random.split(key, 7)
    raw = dict(
        wc=jax.random.normal(ks[0], (c_in, h_dim), jnp.float32) / math.sqrt(c_in),
        bc=0.01 * jax.random.normal(ks[1], (1, h_dim), jnp.float32),
        wf=jax.random.normal(ks[2], (h_dim, h_dim), jnp.float32) / math.sqrt(h_dim),
        bf=0.01 * jax.random.normal(ks[3], (1, h_dim), jnp.float32),
        gamma=1.0 + 0.1 * jax.random.normal(ks[4], (1, h_dim), jnp.float32),
        beta=0.1 * jax.random.normal(ks[5], (1, h_dim), jnp.float32),
        running_mean=jnp.zeros((1, h_dim), jnp.float32),
        running_var=jnp.ones((1, h_dim), jnp.float32),
        ws=jax.random.normal(ks[6], (h_dim, 1), jnp.float32) / math.sqrt(h_dim),
        bs=jnp.zeros((1, 1), jnp.float32),
    )
    return fold_layer_params(raw)


if __name__ == "__main__":
    key = jax.random.PRNGKey(0)
    k_adj, k_x, k1, k2, k3, k4 = jax.random.split(key, 6)

    num_graphs, nodes_per_graph = 2, 16
    n_total = num_graphs * nodes_per_graph

    # Block-diagonal (2 graphs) symmetric 0/1 adjacency, no self loops.
    bern = jax.random.bernoulli(
        k_adj, 0.35, (num_graphs, nodes_per_graph, nodes_per_graph)).astype(jnp.float32)
    sym = jnp.maximum(bern, jnp.swapaxes(bern, 1, 2)) * (1.0 - jnp.eye(nodes_per_graph))
    a_raw = jnp.zeros((n_total, n_total), jnp.float32)
    for g in range(num_graphs):
        lo = g * nodes_per_graph
        a_raw = a_raw.at[lo:lo + nodes_per_graph, lo:lo + nodes_per_graph].set(sym[g])

    x = jax.random.normal(k_x, (n_total, INPUT_DIM), jnp.float32)

    params = [
        init_layer_params(k1, INPUT_DIM, HIDDEN),
        init_layer_params(k2, HIDDEN, HIDDEN),
        init_layer_params(k3, HIDDEN, HIDDEN),
        init_layer_params(k4, HIDDEN, HIDDEN),
    ]

    out = gcn_forward(x, a_raw, nodes_per_graph, params)
    out = jax.block_until_ready(out)
    assert out.shape == (num_graphs, HIDDEN), out.shape
    assert bool(jnp.all(jnp.isfinite(out)))
    # TODO(synk): variable-size graphs / ragged SAGPooling top-k need dynamic
    # shapes (BoundedSlice / scalar-prefetch gather); here graphs are equal-sized.
    print("KERNEL_OK")
</pallas_src>

<mosaic_0001>
module attributes {stable_mosaic.version = 11 : i64} {
  func.func @gcn_block_kernel(%arg0: i32, %arg1: memref<32x32xbf16, #tpu.memory_space<vmem>>, %arg2: memref<32x1xf32, #tpu.memory_space<vmem>>, %arg3: memref<1x32xf32, #tpu.memory_space<vmem>>, %arg4: memref<32x7xf32, #tpu.memory_space<vmem>>, %arg5: memref<7x128xf32, #tpu.memory_space<vmem>>, %arg6: memref<1x128xf32, #tpu.memory_space<vmem>>, %arg7: memref<1x128xf32, #tpu.memory_space<vmem>>, %arg8: memref<1x128xf32, #tpu.memory_space<vmem>>, %arg9: memref<1x128xf32, #tpu.memory_space<vmem>>, %arg10: memref<32x128xf32, #tpu.memory_space<vmem>>, %arg11: memref<32x1xf32, #tpu.memory_space<vmem>>) attributes {dimension_semantics = [#tpu.dimension_semantics<parallel>], iteration_bounds = array<i64: 1>, scalar_prefetch = 0 : i64, scratch_operands = 0 : i64, tpu.core_type = #tpu.core_type<tc>, window_params = [{transform_indices = @transform_0, window_bounds = array<i64: 32, 32>}, {transform_indices = @transform_1, window_bounds = array<i64: 32, 1>}, {pipeline_mode = #tpu.pipeline_mode<synchronous>, transform_indices = @transform_2, window_bounds = array<i64: 1, 32>}, {pipeline_mode = #tpu.pipeline_mode<synchronous>, transform_indices = @transform_3, window_bounds = array<i64: 32, 7>}, {pipeline_mode = #tpu.pipeline_mode<synchronous>, transform_indices = @transform_4, window_bounds = array<i64: 7, 128>}, {pipeline_mode = #tpu.pipeline_mode<synchronous>, transform_indices = @transform_5, window_bounds = array<i64: 1, 128>}, {pipeline_mode = #tpu.pipeline_mode<synchronous>, transform_indices = @transform_6, window_bounds = array<i64: 1, 128>}, {pipeline_mode = #tpu.pipeline_mode<synchronous>, transform_indices = @transform_7, window_bounds = array<i64: 1, 128>}, {pipeline_mode = #tpu.pipeline_mode<synchronous>, transform_indices = @transform_8, window_bounds = array<i64: 1, 128>}, {transform_indices = @transform_9, window_bounds = array<i64: 32, 128>}, {transform_indices = @transform_10, window_bounds = array<i64: 32, 1>}]} {
    %c32_i32 = arith.constant 32 : i32
    %0 = arith.muli %arg0, %c32_i32 : i32
    %1 = tpu.iota {dimensions = array<i32: 0>} : vector<32x32xi32>
    %2 = vector.broadcast %0 : i32 to vector<32x32xi32>
    %3 = arith.addi %2, %1 : vector<32x32xi32>
    %4 = tpu.iota {dimensions = array<i32: 1>} : vector<32x32xi32>
    %c0 = arith.constant 0 : index
    %c0_0 = arith.constant 0 : index
    %5 = vector.load %arg1[%c0, %c0_0] : memref<32x32xbf16, #tpu.memory_space<vmem>>, vector<32x32xbf16>
    %6 = arith.extf %5 : vector<32x32xbf16> to vector<32x32xf32>
    %7 = arith.cmpi eq, %3, %4 : vector<32x32xi32>
    %8 = arith.extui %7 : vector<32x32xi1> to vector<32x32xi32>
    %9 = arith.sitofp %8 : vector<32x32xi32> to vector<32x32xf32>
    %10 = arith.addf %6, %9 : vector<32x32xf32>
    %c0_1 = arith.constant 0 : index
    %c0_2 = arith.constant 0 : index
    %11 = vector.load %arg2[%c0_1, %c0_2] : memref<32x1xf32, #tpu.memory_space<vmem>>, vector<32x1xf32>
    %12 = vector.broadcast %11 : vector<32x1xf32> to vector<32x32xf32>
    %13 = arith.mulf %10, %12 : vector<32x32xf32>
    %c0_3 = arith.constant 0 : index
    %c0_4 = arith.constant 0 : index
    %14 = vector.load %arg3[%c0_3, %c0_4] : memref<1x32xf32, #tpu.memory_space<vmem>>, vector<1x32xf32>
    %15 = vector.broadcast %14 : vector<1x32xf32> to vector<32x32xf32>
    %16 = arith.mulf %13, %15 : vector<32x32xf32>
    %c0_5 = arith.constant 0 : index
    %c0_6 = arith.constant 0 : index
    %17 = vector.load %arg4[%c0_5, %c0_6] : memref<32x7xf32, #tpu.memory_space<vmem>>, vector<32x7xf32>
    %c0_7 = arith.constant 0 : index
    %c0_8 = arith.constant 0 : index
    %18 = vector.load %arg5[%c0_7, %c0_8] : memref<7x128xf32, #tpu.memory_space<vmem>>, vector<7x128xf32>
    %cst = arith.constant dense<0.000000e+00> : vector<32x128xf32>
    %19 = tpu.matmul %17, %18, %cst {dimension_numbers = #tpu.dot_dimension_numbers<[1], [0], [0], [1], [0, 0, 1, 1], [], []>} : vector<32x7xf32>, vector<7x128xf32>, vector<32x128xf32> -> vector<32x128xf32>
    %20 = arith.truncf %16 : vector<32x32xf32> to vector<32x32xbf16>
    %21 = arith.truncf %19 : vector<32x128xf32> to vector<32x128xbf16>
    %cst_9 = arith.constant dense<0.000000e+00> : vector<32x128xf32>
    %22 = tpu.matmul %20, %21, %cst_9 {dimension_numbers = #tpu.dot_dimension_numbers<[1], [0], [0], [1], [0, 0, 1, 1], [], []>} : vector<32x32xbf16>, vector<32x128xbf16>, vector<32x128xf32> -> vector<32x128xf32>
    %c0_10 = arith.constant 0 : index
    %c0_11 = arith.constant 0 : index
    %23 = vector.load %arg6[%c0_10, %c0_11] : memref<1x128xf32, #tpu.memory_space<vmem>>, vector<1x128xf32>
    %24 = vector.broadcast %23 : vector<1x128xf32> to vector<32x128xf32>
    %25 = arith.addf %22, %24 : vector<32x128xf32>
    %cst_12 = arith.constant 0.000000e+00 : f32
    %26 = vector.broadcast %cst_12 : f32 to vector<32x128xf32>
    %27 = arith.maximumf %25, %26 : vector<32x128xf32>
    %c0_13 = arith.constant 0 : index
    %c0_14 = arith.constant 0 : index
    %28 = vector.load %arg7[%c0_13, %c0_14] : memref<1x128xf32, #tpu.memory_space<vmem>>, vector<1x128xf32>
    %29 = vector.broadcast %28 : vector<1x128xf32> to vector<32x128xf32>
    %30 = arith.mulf %27, %29 : vector<32x128xf32>
    %c0_15 = arith.constant 0 : index
    %c0_16 = arith.constant 0 : index
    %31 = vector.load %arg8[%c0_15, %c0_16] : memref<1x128xf32, #tpu.memory_space<vmem>>, vector<1x128xf32>
    %32 = vector.broadcast %31 : vector<1x128xf32> to vector<32x128xf32>
    %33 = arith.addf %30, %32 : vector<32x128xf32>
    %c0_17 = arith.constant 0 : index
    %c0_18 = arith.constant 0 : index
    %34 = vector.load %arg10[%c0_17, %c0_18] : memref<32x128xf32, #tpu.memory_space<vmem>>, vector<32x128xf32>
    tpu.vector_store %arg10[%c0_17, %c0_18], %33 {strides = array<i32>} : memref<32x128xf32, #tpu.memory_space<vmem>>, vector<32x128xf32>,
    %c0_19 = arith.constant 0 : index
    %c0_20 = arith.constant 0 : index
    %35 = vector.load %arg9[%c0_19, %c0_20] : memref<1x128xf32, #tpu.memory_space<vmem>>, vector<1x128xf32>
    %36 = vector.broadcast %35 : vector<1x128xf32> to vector<32x128xf32>
    %37 = arith.mulf %33, %36 : vector<32x128xf32>
    %cst_21 = arith.constant dense<0.000000e+00> : vector<32xf32>
    %38 = vector.multi_reduction <add>, %37, %cst_21 [1] : vector<32x128xf32> to vector<32xf32>
    %39 = vector.shape_cast %38 : vector<32xf32> to vector<32x1xf32>
    %c0_22 = arith.constant 0 : index
    %c0_23 = arith.constant 0 : index
    %40 = vector.load %arg11[%c0_22, %c0_23] : memref<32x1xf32, #tpu.memory_space<vmem>>, vector<32x1xf32>
    tpu.vector_store %arg11[%c0_22, %c0_23], %39 {strides = array<i32>} : memref<32x1xf32, #tpu.memory_space<vmem>>, vector<32x1xf32>,
    return
  }
  func.func @transform_0(%arg0: i32) -> (i32, i32) {
    %c0_i32 = arith.constant 0 : i32
    %c0_i32_0 = arith.constant 0 : i32
    return %arg0, %c0_i32 : i32, i32
  }
  func.func @transform_1(%arg0: i32) -> (i32, i32) {
    %c0_i32 = arith.constant 0 : i32
    %c0_i32_0 = arith.constant 0 : i32
    return %arg0, %c0_i32 : i32, i32
  }
  func.func @transform_2(%arg0: i32) -> (i32, i32) {
    %c0_i32 = arith.constant 0 : i32
    %c0_i32_0 = arith.constant 0 : i32
    %c0_i32_1 = arith.constant 0 : i32
    return %c0_i32, %c0_i32_0 : i32, i32
  }
  func.func @transform_3(%arg0: i32) -> (i32, i32) {
    %c0_i32 = arith.constant 0 : i32
    %c0_i32_0 = arith.constant 0 : i32
    %c0_i32_1 = arith.constant 0 : i32
    return %c0_i32, %c0_i32_0 : i32, i32
  }
  func.func @transform_4(%arg0: i32) -> (i32, i32) {
    %c0_i32 = arith.constant 0 : i32
    %c0_i32_0 = arith.constant 0 : i32
    %c0_i32_1 = arith.constant 0 : i32
    return %c0_i32, %c0_i32_0 : i32, i32
  }
  func.func @transform_5(%arg0: i32) -> (i32, i32) {
    %c0_i32 = arith.constant 0 : i32
    %c0_i32_0 = arith.constant 0 : i32
    %c0_i32_1 = arith.constant 0 : i32
    return %c0_i32, %c0_i32_0 : i32, i32
  }
  func.func @transform_6(%arg0: i32) -> (i32, i32) {
    %c0_i32 = arith.constant 0 : i32
    %c0_i32_0 = arith.constant 0 : i32
    %c0_i32_1 = arith.constant 0 : i32
    return %c0_i32, %c0_i32_0 : i32, i32
  }
  func.func @transform_7(%arg0: i32) -> (i32, i32) {
    %c0_i32 = arith.constant 0 : i32
    %c0_i32_0 = arith.constant 0 : i32
    %c0_i32_1 = arith.constant 0 : i32
    return %c0_i32, %c0_i32_0 : i32, i32
  }
  func.func @transform_8(%arg0: i32) -> (i32, i32) {
    %c0_i32 = arith.constant 0 : i32
    %c0_i32_0 = arith.constant 0 : i32
    %c0_i32_1 = arith.constant 0 : i32
    return %c0_i32, %c0_i32_0 : i32, i32
  }
  func.func @transform_9(%arg0: i32) -> (i32, i32) {
    %c0_i32 = arith.constant 0 : i32
    %c0_i32_0 = arith.constant 0 : i32
    return %arg0, %c0_i32 : i32, i32
  }
  func.func @transform_10(%arg0: i32) -> (i32, i32) {
    %c0_i32 = arith.constant 0 : i32
    %c0_i32_0 = arith.constant 0 : i32
    return %arg0, %c0_i32 : i32, i32
  }
}

</mosaic_0001>

<bundles_post_ra>
// kernel: tpu_custom_call.1
= control target key start
LH: loop header
LB: loop body
LE: loop exit
PB: predicated region body
PF: predicated region fallthrough
CT: control target
= control target key end

     0   :  { %vm130_vm0 = vcmask 1046528   ;;  %vm117_vm1 = vcmask 56320   ;;  %v441_v5 = vmov 0   ;;  %s579_s0 = inlined_call_operand.vmem [shape: bf16[32,32], index: 0, kind: input, shape index: {}]   ;;  %s580_s1 = inlined_call_operand.vmem [shape: f32[32,1], index: 1, kind: input, shape index: {}]   ;;  %s581_s2 = inlined_call_operand.vmem [shape: f32[1,32], index: 2, kind: input, shape index: {}]   ;;  %s582_s3 = inlined_call_operand.vmem [shape: f32[32,7], index: 3, kind: input, shape index: {}]   ;;  %s583_s4 = inlined_call_operand.vmem [shape: f32[7,128], index: 4, kind: input, shape index: {}]   ;;  %s584_s5 = inlined_call_operand.vmem [shape: f32[1,128], index: 5, kind: input, shape index: {}]   ;;  %s585_s6 = inlined_call_operand.vmem [shape: f32[1,128], index: 6, kind: input, shape index: {}]   ;;  %s586_s7 = inlined_call_operand.vmem [shape: f32[1,128], index: 7, kind: input, shape index: {}]   ;;  %s587_s8 = inlined_call_operand.vmem [shape: f32[1,128], index: 8, kind: input, shape index: {}]   ;;  %s588_s9 = inlined_call_operand.hbm [shape: f32[32,128], index: 9, kind: output, shape index: {0}]   ;;  %s589_s10 = inlined_call_operand.vmem [shape: f32[32,1], index: 10, kind: output, shape index: {1}]  }
   0x1   :  { %v116_v0 = vld [vmem:[%s583_s4] sm:$0x7f]  ;;  %v113_v2 = vld [vmem:[%s582_s3 + $0x8] sm:$0xff]  ;;  %v114_v3 = vld [vmem:[%s582_s3 + $0x10] sm:$0xff]  ;;  %415 = vset.pattern.permute.xlu0 %v441_v5  ;;  %416 = vset.pattern.permute.xlu1 %v441_v5 }
   0x2   :  { %v112_v1 = vld [vmem:[%s582_s3] sm:$0xff]  ;;  %394 = vmatprep.subr.msk.mxu0 %vm130_vm0, %v116_v0  ;;  %v75_v6 = vld [vmem:[%s580_s1 + $0x10] sm:$0xff] }
   0x3   :  { %396 = vmatprep.mubr.msk.f32.mxu0 %vm117_vm1, %v112_v1  ;;  %v73_v4 = vld [vmem:[%s580_s1] sm:$0xff]  ;;  %395 = vmatpush3.msk.msra.mxu0 %vm130_vm0, %v116_v0 }
   0x4   :  { %397 = vmatmul.mubr.msk.f32.vlgmr.msra.gmra.mrb[0].mxu0 %vm117_vm1, %v113_v2 }
   0x5   :  { %16 = vsyncpa [#allocation3], 0  ;;  %399 = vmatprep.mubr.msk.f32.mxu0 %vm117_vm1, %v114_v3  ;;  %v115_v7 = vld [vmem:[%s582_s3 + $0x18] sm:$0xff]  ;;  %79 = vperm.xlu0 %415, %v73_v4   ;;  %v74_v8 = vld [vmem:[%s580_s1 + $0x8] sm:$0xff]  ;;  %v37_v10 = vlaneseq  ;;  %v442_v16 = vmov 0.0   ;;  %vm230_vm4 = vcmask 261120  }
   0x6   :  { %89 = vperm.xlu1 %416, %v75_v6   ;;  %v76_v9 = vld [vmem:[%s580_s1 + $0x18] sm:$0xff]  ;;  %v377_v13 = vld [vmem:[%s579_s0] sm:$0xff]   ;;  %v384_v32 = vld [vmem:[%s579_s0 + $0x8] sm:$0xff]  }
   0x7   :  { %v38_v11 = vshrl.u32 %v37_v10, 7  ;;  %v48_v12 = vand.u32 127, %v37_v10  ;;  %v378_v15 = vunpack.c.l.bf16 %v377_v13  ;;  %v379_v19 = vunpack.c.h.bf16 %v377_v13  ;;  %v364_v24 = vld [vmem:[%s581_s2] ss:$0 sm:$0xff] }
   0x8   :  { %400 = vmatmul.mubr.msk.f32.gmra.mrb[2].mxu0 %vm117_vm1, %v115_v7  ;;  %v382_v34 = vunpack.c.l.bf16 %v384_v32  ;;  %v383_v35 = vunpack.c.h.bf16 %v384_v32  ;;  %v370_v52 = vld [vmem:[%s584_s5] ss:$0 sm:$0xff] }
   0x9   :  { %84 = vperm.xlu0 %415, %v74_v8   ;;  %vm57_vm2 = vcmp.eq.s32.totalorder %v38_v11, %v48_v12  ;;  %v39_v14 = vadd.s32 8, %v38_v11  ;;  %v40_v30 = vadd.s32 16, %v38_v11  ;;  %v41_v31 = vadd.s32 24, %v38_v11  ;;  %v373_v56 = vld [vmem:[%s585_s6] ss:$0 sm:$0xff]  ;;  %s443_s6 = smov [#allocation2]  }
   0xa   :  { %94 = vperm.xlu1 %416, %v76_v9   ;;  %v360_v17 = vsel %vm57_vm2, 1.0, %v442_v16  ;;  %v374_v0 = vld [vmem:[%s586_s7] ss:$0 sm:$0xff]  ;;  %s345_s7 = sshll.u32 %s443_s6, 4  ;;  %s346_s7 = int_to_ptr.vmem [resolvable:$true] %s345_s7 }
   0xb   :  { %vm58_vm3 = vcmp.eq.s32.totalorder %v39_v14, %v48_v12  ;;  %v69_v18 = vadd.f32 %v378_v15, %v360_v17  ;;  %vm59_vm5 = vcmp.eq.s32.totalorder %v40_v30, %v48_v12  ;;  %vm60_vm6 = vcmp.eq.s32.totalorder %v41_v31, %v48_v12  ;;  %v375_v6 = vld [vmem:[%s587_s8] ss:$0 sm:$0xff]  ;;  %s417_s8 = scalar_lea.vmem %s346_s7, 512  ;;  %p422_p1 = scmp.lt.s32.totalorder %s346_s7, %s346_s7 }
   0xc   :  { %v361_v20 = vsel %vm58_vm3, 1.0, %v442_v16  ;;  %v362_v36 = vsel %vm59_vm5, 1.0, %v442_v16  ;;  %v363_v37 = vsel %vm60_vm6, 1.0, %v442_v16  ;;  %p418_p0 = scmp.ne.s32.totalorder %s346_s7, %s417_s8  ;;  %p423_p2 = scmp.lt.s32.totalorder %s417_s8, %s417_s8 }
   0xd   :  { %v70_v23 = vadd.f32 %v379_v19, %v361_v20  ;;  %v71_v38 = vadd.f32 %v382_v34, %v362_v36  ;;  %v72_v39 = vadd.f32 %v383_v35, %v363_v37 }
   0xe   :  { %p424_p3 = por %p423_p2, %p422_p1 }
  0x10   :  { %p425_p4 = pnand %p424_p3, %p418_p0 }
  0x84   :  { %v80_v21 = vpop.permute.xlu0 %79 }
  0x85   :  { %v97_v22 = vmul.f32 %v80_v21, %v69_v18  ;;  %v90_v33 = vpop.permute.xlu1 %89 }
  0x86   :  { %v99_v43 = vmul.f32 %v90_v33, %v71_v38 }
  0x87   :  { %v108_v26 = vmul.f32 %v364_v24, %v97_v22 }
  0x88   :  { %v85_v25 = vpop.permute.xlu0 %84  ;;  %v110_v48 = vmul.f32 %v364_v24, %v99_v43 }
  0x89   :  { %v98_v27 = vmul.f32 %v85_v25, %v70_v23  ;;  %v95_v40 = vpop.permute.xlu1 %94 }
  0x8a   :  { %v100_v45 = vmul.f32 %v95_v40, %v72_v39 }
  0x8b   :  { %v109_v28 = vmul.f32 %v364_v24, %v98_v27 }
  0x8c   :  { %v111_v49 = vmul.f32 %v364_v24, %v100_v45 }
  0x8d   :  { %v219_v29 = vpack.c.bf16 %v109_v28, %v108_v26 }
  0x8e   :  { %v220_v51 = vpack.c.bf16 %v111_v49, %v110_v48 }
  0x8f   :  { %406 = vmatprep.mubr.msk.bf16.mxu1 %vm230_vm4, %v219_v29 }
  0xd7   :  { %v398_v41 = vpop.f32.mrb[0].mxu0 }
  0xd8   :  { %v200_v42 = vpop.f32.mrb[1].mxu0 }
  0xd9   :  { %v221_v44 = vpack.c.bf16 %v398_v41, %v200_v42 }
  0xdb   :  { %v401_v46 = vpop.f32.mrb[2].mxu0  ;;  %402 = vmatprep.subr.bf16.mxu1 %v221_v44 }
  0xdc   :  { %v210_v47 = vpop.f32.mrb[3].mxu0  ;;  %403 = vmatpush3.bf16.msra.mxu1 %v221_v44 }
  0xdd   :  { %v222_v50 = vpack.c.bf16 %v401_v46, %v210_v47 }
  0xdf   :  { %404 = vmatprep.subr.bf16.mxu1 %v222_v50 }
  0xe0   :  { %405 = vmatpush3.bf16.msra.mxu1 %v222_v50 }
  0xe3   :  { %407 = vmatmul.mubr.msk.bf16.vlgmr.msra.gmra.mrb[0].mxu1 %vm230_vm4, %v220_v51 }
 0x1b6   :  { %v408_v53 = vpop.f32.mrb[0].mxu1 }
 0x1b7   :  { %v280_v54 = vadd.f32 %v408_v53, %v370_v52  ;;  %v271_v55 = vpop.f32.mrb[1].mxu1 }
 0x1b8   :  { %v272_v57 = vadd.f32 %v370_v52, %v271_v55  ;;  %v409_v58 = vpop.f32.mrb[2].mxu1 }
 0x1b9   :  { %v288_v59 = vmax.f32 %v280_v54, 0.0  ;;  %v283_v60 = vadd.f32 %v409_v58, %v370_v52  ;;  %v274_v61 = vpop.f32.mrb[3].mxu1 }
 0x1ba   :  { %v286_v62 = vmax.f32 %v272_v57, 0.0  ;;  %v275_v63 = vadd.f32 %v370_v52, %v274_v61 }
 0x1bb   :  { %v299_v1 = vmul.f32 %v373_v56, %v288_v59  ;;  %v289_v2 = vmax.f32 %v283_v60, 0.0 }
 0x1bc   :  { %v297_v3 = vmul.f32 %v373_v56, %v286_v62  ;;  %v287_v4 = vmax.f32 %v275_v63, 0.0 }
 0x1bd   :  { %v300_v5 = vmul.f32 %v373_v56, %v289_v2  ;;  %v310_v7 = vadd.f32 %v374_v0, %v299_v1 }
 0x1be   :  { %v298_v8 = vmul.f32 %v373_v56, %v287_v4  ;;  %v308_v9 = vadd.f32 %v374_v0, %v297_v3 }
 0x1bf   :  { %314 = vst [vmem:[#allocation2 + $0x10] sm:$0xff] %v310_v7  ;;  %v311_v10 = vadd.f32 %v374_v0, %v300_v5  ;;  %v325_v14 = vmul.f32 %v375_v6, %v310_v7 }
 0x1c0   :  { %v323_v11 = vmul.f32 %v375_v6, %v308_v9  ;;  %312 = vst [vmem:[#allocation2] sm:$0xff] %v308_v9  ;;  %v309_v12 = vadd.f32 %v374_v0, %v298_v8 }
 0x1c1   :  { %315 = vst [vmem:[#allocation2 + $0x18] sm:$0xff] %v311_v10  ;;  %v326_v15 = vmul.f32 %v375_v6, %v311_v10 }
 0x1c2   :  { %327 = vadd.xlane.f32.xlu0 %v323_v11  ;;  %v324_v13 = vmul.f32 %v375_v6, %v309_v12  ;;  %313 = vst [vmem:[#allocation2 + $0x8] sm:$0xff] %v309_v12 }
 0x1c4   :  { %329 = vadd.xlane.f32.xlu1 %v324_v13 }
 0x1c6   :  { %331 = vadd.xlane.f32.xlu0 %v325_v14 }
 0x1ca   :  { %333 = vadd.xlane.f32.xlu0 %v326_v15 }
 0x1cb   :  { %428 = shalt.err (!%p425_p4)
}
 0x1cc   :  { %s429_s21 = scalar_lea.hbm %s588_s9, 512 }
 0x1cd   :  { %p430_p5 = scmp.ne.s32.totalorder %s588_s9, %s429_s21  ;;  %p433_p6 = scmp.lt.u32.totalorder %s429_s21, %s588_s9 }
 0x1cf   :  { %p435_p7 = pnand %p433_p6, %p430_p5 }
 0x1d1   :  { %438 = shalt.err (!%p435_p7)
}
 0x1d2   :  { %s444_s25 = smov 128   ;;  %s445_s26 = smov 8   ;;  %vm335_vm7 = vcmask 7168  }
 0x1d3   :  { %351 = dma.vmem_to_hbm [thread:$0]  %s346_s7, 512, %s588_s9, [#allocation3], %s444_s25, %s444_s25, %s445_s26  }
 0x24f   :  { %v328_v16 = vpop.xlane.xlu0 %327 }
 0x250   :  { %336 = vst.msk [vmem:[%s589_s10] sm:$0xff] %vm335_vm7, %v328_v16 }
 0x251   :  { %v330_v17 = vpop.xlane.xlu1 %329 }
 0x252   :  { %337 = vst.msk [vmem:[%s589_s10 + $0x8] sm:$0xff] %vm335_vm7, %v330_v17 }
 0x253   :  { %v332_v18 = vpop.xlane.xlu0 %331 }
 0x254   :  { %338 = vst.msk [vmem:[%s589_s10 + $0x10] sm:$0xff] %vm335_vm7, %v332_v18 }
 0x257   :  { %v334_v19 = vpop.xlane.xlu0 %333 }
 0x258   :  { %339 = vst.msk [vmem:[%s589_s10 + $0x18] sm:$0xff] %vm335_vm7, %v334_v19 }
 0x259   :  { %439 = dma.done.wait [#allocation3], 512  }
 0x25a   :  { %440 = vsyncadd [#allocation3], 4294966784 }
 0x25b   :  { %359 = vsyncpa [#allocation3], 1 }

</bundles_post_ra>
